<compile_context>
chip_gen: v7x
topology: tpu7x:2x2x1
jax: 0.10.0
libtpu: 0.0.40
codegen_flags: <defaults>
</compile_context>

<pallas_src>
import functools

import jax
import jax.numpy as jnp
from jax.experimental import pallas as pl
from jax.experimental.pallas import tpu as pltpu


# ----------------------------------------------------------------------------
# Pallas kernel: fused all-expert MLP + gated accumulation (single invocation)
# ----------------------------------------------------------------------------
def _moe_fused_kernel(x_ref, w1f_ref, b1f_ref, w2b_ref, b2f_ref,
                      gates_ref, expand_ref, ones_blk_ref, sel_ref, out_ref):
    """Shapes (all full VMEM blocks):
      x:(B,Din) f32          w1f:(Din,E*H) bf16      b1f:(1,E*H) f32
      w2b:(E*H,E*Dout) bf16  b2f:(1,E*Dout) f32      gates:(B,E) f32
      expand:(E,E*Dout) f32  ones_blk:(E*Dout,E*Dout) f32  sel:(E*Dout,Dout) f32
      out:(B,Dout) f32
    """
    E = expand_ref.shape[0]
    Dout = sel_ref.shape[1]
    B = x_ref.shape[0]

    # (1) All-expert first layer: one lane-dense bf16 MXU pass, f32 accumulation.
    xb = x_ref[...].astype(jnp.bfloat16)
    h_all = jnp.dot(xb, w1f_ref[...], preferred_element_type=jnp.float32)
    h_all = jnp.maximum(h_all + b1f_ref[...], 0.0)                  # (B, E*H) f32

    # (2) All-expert second layer: single block-diagonal matmul (one MXU pass).
    logits = jnp.dot(h_all.astype(jnp.bfloat16), w2b_ref[...],
                     preferred_element_type=jnp.float32) + b2f_ref[...]   # (B, E*Dout)

    # (3) Per-expert (segment-wise) softmax, kept lane-dense:
    #     per-segment maxes (8 tiny slices, XLU slot is idle) -> (B, E), broadcast
    #     back to the slab via one MXU multiply with `expand`; exp and the EXACT
    #     divide run on the whole (B, E*Dout) slab.
    m_col = jnp.concatenate(
        [jnp.max(logits[:, e * Dout:(e + 1) * Dout], axis=-1, keepdims=True)
         for e in range(E)], axis=1)                                # (B, E)
    m_rep = jnp.dot(m_col, expand_ref[...],
                    preferred_element_type=jnp.float32)             # (B, E*Dout)
    ex = jnp.exp(logits - m_rep)                                    # whole-slab EUP
    denom = jnp.dot(ex, ones_blk_ref[...],
                    preferred_element_type=jnp.float32)             # segment sums
    p = ex / denom                                                  # exact softmax

    # (4) Dispatcher combine: exp() of the stitched expert outputs, gate-weighted,
    #     then summed over experts with a selection matmul (y[b,d] = sum_e ...).
    gates_rep = jnp.dot(gates_ref[...], expand_ref[...],
                        preferred_element_type=jnp.float32)         # (B, E*Dout)
    combined = gates_rep * jnp.exp(p)                               # whole-slab VPU/EUP
    out_ref[...] = jnp.dot(combined, sel_ref[...],
                           preferred_element_type=jnp.float32)      # (B, Dout)


def moe_experts_combine(x, packed, gates):
    """x:(B,Din) f32, gates:(B,E) f32, packed: pre-transformed expert weights."""
    B = x.shape[0]
    Dout = packed["sel"].shape[1]
    return pl.pallas_call(
        _moe_fused_kernel,
        out_shape=jax.ShapeDtypeStruct((B, Dout), jnp.float32),
        in_specs=[pl.BlockSpec(memory_space=pltpu.MemorySpace.VMEM)
                  for _ in range(9)],
        out_specs=pl.BlockSpec(memory_space=pltpu.MemorySpace.VMEM),
    )(x, packed["w1_flat"], packed["b1_flat"], packed["w2_blk"], packed["b2_flat"],
      gates, packed["expand"], packed["ones_blk"], packed["sel"])


# ----------------------------------------------------------------------------
# One-time layout plumbing (hoisted out of the per-call path, feedback item 3)
# ----------------------------------------------------------------------------
def pack_expert_params(params):
    w1, b1, w2, b2 = params["w1"], params["b1"], params["w2"], params["b2"]
    E, Din, H = w1.shape
    Dout = w2.shape[2]

    # Lane-dense first layer: concat all expert W1 / b1 along the lane axis.
    w1_flat = jnp.transpose(w1, (1, 0, 2)).reshape(Din, E * H).astype(jnp.bfloat16)
    b1_flat = b1.reshape(1, E * H).astype(jnp.float32)

    # Block-diagonal second layer: W2_blk[e*H+h, f*Dout+d] = W2[e,h,d] * (e==f).
    w2_blk = jnp.einsum('ehd,ef->ehfd', w2, jnp.eye(E, dtype=w2.dtype))
    w2_blk = w2_blk.reshape(E * H, E * Dout).astype(jnp.bfloat16)
    b2_flat = b2.reshape(1, E * Dout).astype(jnp.float32)

    # Constant 0/1 matrices for MXU-side broadcast / segmented-sum / reduction.
    expand = jnp.repeat(jnp.eye(E, dtype=jnp.float32), Dout, axis=1)        # (E, E*Dout)
    ones_blk = jnp.kron(jnp.eye(E, dtype=jnp.float32),
                        jnp.ones((Dout, Dout), jnp.float32))                # (E*Dout, E*Dout)
    sel = jnp.tile(jnp.eye(Dout, dtype=jnp.float32), (E, 1))                # (E*Dout, Dout)

    return dict(w1_flat=w1_flat, b1_flat=b1_flat, w2_blk=w2_blk, b2_flat=b2_flat,
                expand=expand, ones_blk=ones_blk, sel=sel)


# ----------------------------------------------------------------------------
# Gating / auxiliary-loss glue (plain JAX)
# ----------------------------------------------------------------------------
def _normal_cdf(z):
    return 0.5 * (1.0 + jax.lax.erf(z / jnp.sqrt(2.0)))


def _cv_squared(v):
    eps = 1e-10
    if v.shape[0] == 1:
        return jnp.zeros(())
    mean = jnp.mean(v)
    var = jnp.var(v, ddof=1)          # torch .var() is unbiased
    return var / (mean ** 2 + eps)


def noisy_top_k_gating(x, w_gate, w_noise, key, k, train=True, noise_epsilon=1e-2):
    B = x.shape[0]
    E = w_gate.shape[1]

    clean_logits = x @ w_gate
    raw_noise_stddev = x @ w_noise
    noise_stddev = (jax.nn.softplus(raw_noise_stddev) + noise_epsilon) * float(train)
    noise = jax.random.normal(key, clean_logits.shape, dtype=clean_logits.dtype)
    noisy_logits = clean_logits + noise * noise_stddev
    logits = noisy_logits

    m = min(k + 1, E)
    top_logits, top_indices = jax.lax.top_k(logits, m)
    top_k_logits = top_logits[:, :k]
    top_k_indices = top_indices[:, :k]
    top_k_gates = jax.nn.softmax(top_k_logits, axis=1)

    gates = jnp.zeros_like(logits)
    gates = gates.at[jnp.arange(B)[:, None], top_k_indices].set(top_k_gates)

    if k < E:
        # _prob_in_top_k
        threshold_if_in = top_logits[:, k:k + 1]       # (k+1)-th largest
        threshold_if_out = top_logits[:, k - 1:k]      # k-th largest
        is_in = noisy_logits > threshold_if_in
        prob_if_in = _normal_cdf((clean_logits - threshold_if_in) / noise_stddev)
        prob_if_out = _normal_cdf((clean_logits - threshold_if_out) / noise_stddev)
        prob = jnp.where(is_in, prob_if_in, prob_if_out)
        load = prob.sum(0)
    else:
        load = (gates > 0).sum(0).astype(jnp.float32)
    return gates, load


@functools.partial(jax.jit, static_argnames=("k", "loss_coef"))
def moe_forward(x, params, packed, noise_key, k=4, loss_coef=0.01):
    gates, load = noisy_top_k_gating(
        x, params["w_gate"], params["w_noise"], noise_key, k, train=True)

    importance = gates.sum(0)
    loss = (_cv_squared(importance) + _cv_squared(load)) * loss_coef

    y = moe_experts_combine(x, packed, gates)
    return y, loss


# ----------------------------------------------------------------------------
# Pure-JAX f32 reference for the expert combine (correctness cross-check)
# ----------------------------------------------------------------------------
def _moe_reference(x, params, gates):
    w1, b1, w2, b2 = params["w1"], params["b1"], params["w2"], params["b2"]
    h = jnp.maximum(jnp.einsum('bd,edh->ebh', x, w1) + b1, 0.0)        # (E,B,H)
    logits = jnp.einsum('ebh,ehd->ebd', h, w2) + b2                    # (E,B,Dout)
    p = jax.nn.softmax(logits, axis=-1)
    return jnp.einsum('be,ebd->bd', gates, jnp.exp(p))


# ----------------------------------------------------------------------------
# Deterministic parameter construction (mirrors __init__ shapes)
# ----------------------------------------------------------------------------
def init_params(key, input_size, output_size, num_experts, hidden_size):
    # w_gate / w_noise are zeros in the PyTorch __init__.
    w_gate = jnp.zeros((input_size, num_experts), jnp.float32)
    w_noise = jnp.zeros((input_size, num_experts), jnp.float32)

    # Expert MLPs: Linear(in, hidden) -> ReLU -> Linear(hidden, out) -> Softmax.
    # PyTorch default Linear init: U(-1/sqrt(fan_in), 1/sqrt(fan_in)).
    k1, k2, k3, k4 = jax.random.split(key, 4)
    lim1 = 1.0 / jnp.sqrt(input_size)
    lim2 = 1.0 / jnp.sqrt(hidden_size)
    w1 = jax.random.uniform(k1, (num_experts, input_size, hidden_size),
                            jnp.float32, -lim1, lim1)
    b1 = jax.random.uniform(k2, (num_experts, 1, hidden_size),
                            jnp.float32, -lim1, lim1)
    w2 = jax.random.uniform(k3, (num_experts, hidden_size, output_size),
                            jnp.float32, -lim2, lim2)
    b2 = jax.random.uniform(k4, (num_experts, 1, output_size),
                            jnp.float32, -lim2, lim2)
    return dict(w_gate=w_gate, w_noise=w_noise, w1=w1, b1=b1, w2=w2, b2=b2)


if __name__ == "__main__":
    input_size = 32
    output_size = 32
    hidden_size = 32
    num_experts = 8
    k = 4
    batch = 8

    root = jax.random.PRNGKey(0)
    k_params, k_x, k_noise = jax.random.split(root, 3)

    params = init_params(k_params, input_size, output_size, num_experts, hidden_size)
    packed = pack_expert_params(params)          # one-time layout plumbing
    x = jax.random.normal(k_x, (batch, input_size), jnp.float32)

    y, loss = moe_forward(x, params, packed, k_noise, k=k, loss_coef=0.01)
    y = jax.block_until_ready(y)
    loss = jax.block_until_ready(loss)

    assert y.shape == (batch, output_size)
    assert loss.shape == ()

    # Cross-check the Pallas expert combine against a pure-f32 JAX reference.
    # Softmax divide in the kernel is exact; the residual is only bf16 rounding of
    # the MXU inputs (weights / activations), well inside 2e-2.
    gates, _ = noisy_top_k_gating(
        x, params["w_gate"], params["w_noise"], k_noise, k, train=True)
    y_ref = _moe_reference(x, params, gates)
    assert jnp.allclose(y, y_ref, rtol=2e-2, atol=2e-2), "mismatch vs JAX reference"

    print("KERNEL_OK")
</pallas_src>

<mosaic_0001>
module attributes {stable_mosaic.version = 11 : i64} {
  func.func @_moe_fused_kernel(%arg0: memref<8x32xf32, #tpu.memory_space<vmem>>, %arg1: memref<32x256xbf16, #tpu.memory_space<vmem>>, %arg2: memref<1x256xf32, #tpu.memory_space<vmem>>, %arg3: memref<256x256xbf16, #tpu.memory_space<vmem>>, %arg4: memref<1x256xf32, #tpu.memory_space<vmem>>, %arg5: memref<8x8xf32, #tpu.memory_space<vmem>>, %arg6: memref<8x256xf32, #tpu.memory_space<vmem>>, %arg7: memref<256x256xf32, #tpu.memory_space<vmem>>, %arg8: memref<256x32xf32, #tpu.memory_space<vmem>>, %arg9: memref<8x32xf32, #tpu.memory_space<vmem>>) attributes {dimension_semantics = [], scalar_prefetch = 0 : i64, scratch_operands = 0 : i64, tpu.core_type = #tpu.core_type<tc>} {
    %c0 = arith.constant 0 : index
    %c0_0 = arith.constant 0 : index
    %0 = vector.load %arg0[%c0, %c0_0] : memref<8x32xf32, #tpu.memory_space<vmem>>, vector<8x32xf32>
    %1 = arith.truncf %0 : vector<8x32xf32> to vector<8x32xbf16>
    %c0_1 = arith.constant 0 : index
    %c0_2 = arith.constant 0 : index
    %2 = vector.load %arg1[%c0_1, %c0_2] : memref<32x256xbf16, #tpu.memory_space<vmem>>, vector<32x256xbf16>
    %cst = arith.constant dense<0.000000e+00> : vector<8x256xf32>
    %3 = tpu.matmul %1, %2, %cst {dimension_numbers = #tpu.dot_dimension_numbers<[1], [0], [0], [1], [0, 0, 1, 1], [], []>} : vector<8x32xbf16>, vector<32x256xbf16>, vector<8x256xf32> -> vector<8x256xf32>
    %c0_3 = arith.constant 0 : index
    %c0_4 = arith.constant 0 : index
    %4 = vector.load %arg2[%c0_3, %c0_4] : memref<1x256xf32, #tpu.memory_space<vmem>>, vector<1x256xf32>
    %5 = vector.broadcast %4 : vector<1x256xf32> to vector<8x256xf32>
    %6 = arith.addf %3, %5 : vector<8x256xf32>
    %cst_5 = arith.constant 0.000000e+00 : f32
    %7 = vector.broadcast %cst_5 : f32 to vector<8x256xf32>
    %8 = arith.maximumf %6, %7 : vector<8x256xf32>
    %9 = arith.truncf %8 : vector<8x256xf32> to vector<8x256xbf16>
    %c0_6 = arith.constant 0 : index
    %c0_7 = arith.constant 0 : index
    %10 = vector.load %arg3[%c0_6, %c0_7] : memref<256x256xbf16, #tpu.memory_space<vmem>>, vector<256x256xbf16>
    %cst_8 = arith.constant dense<0.000000e+00> : vector<8x256xf32>
    %11 = tpu.matmul %9, %10, %cst_8 {dimension_numbers = #tpu.dot_dimension_numbers<[1], [0], [0], [1], [0, 0, 1, 1], [], []>} : vector<8x256xbf16>, vector<256x256xbf16>, vector<8x256xf32> -> vector<8x256xf32>
    %c0_9 = arith.constant 0 : index
    %c0_10 = arith.constant 0 : index
    %12 = vector.load %arg4[%c0_9, %c0_10] : memref<1x256xf32, #tpu.memory_space<vmem>>, vector<1x256xf32>
    %13 = vector.broadcast %12 : vector<1x256xf32> to vector<8x256xf32>
    %14 = arith.addf %11, %13 : vector<8x256xf32>
    %15 = vector.extract_strided_slice %14 {offsets = [0, 0], sizes = [8, 32], strides = [1, 1]} : vector<8x256xf32> to vector<8x32xf32>
    %cst_11 = arith.constant dense<0xFF800000> : vector<8xf32>
    %16 = vector.multi_reduction <maximumf>, %15, %cst_11 [1] : vector<8x32xf32> to vector<8xf32>
    %17 = vector.shape_cast %16 : vector<8xf32> to vector<8x1xf32>
    %18 = vector.extract_strided_slice %14 {offsets = [0, 32], sizes = [8, 32], strides = [1, 1]} : vector<8x256xf32> to vector<8x32xf32>
    %cst_12 = arith.constant dense<0xFF800000> : vector<8xf32>
    %19 = vector.multi_reduction <maximumf>, %18, %cst_12 [1] : vector<8x32xf32> to vector<8xf32>
    %20 = vector.shape_cast %19 : vector<8xf32> to vector<8x1xf32>
    %21 = vector.extract_strided_slice %14 {offsets = [0, 64], sizes = [8, 32], strides = [1, 1]} : vector<8x256xf32> to vector<8x32xf32>
    %cst_13 = arith.constant dense<0xFF800000> : vector<8xf32>
    %22 = vector.multi_reduction <maximumf>, %21, %cst_13 [1] : vector<8x32xf32> to vector<8xf32>
    %23 = vector.shape_cast %22 : vector<8xf32> to vector<8x1xf32>
    %24 = vector.extract_strided_slice %14 {offsets = [0, 96], sizes = [8, 32], strides = [1, 1]} : vector<8x256xf32> to vector<8x32xf32>
    %cst_14 = arith.constant dense<0xFF800000> : vector<8xf32>
    %25 = vector.multi_reduction <maximumf>, %24, %cst_14 [1] : vector<8x32xf32> to vector<8xf32>
    %26 = vector.shape_cast %25 : vector<8xf32> to vector<8x1xf32>
    %27 = vector.extract_strided_slice %14 {offsets = [0, 128], sizes = [8, 32], strides = [1, 1]} : vector<8x256xf32> to vector<8x32xf32>
    %cst_15 = arith.constant dense<0xFF800000> : vector<8xf32>
    %28 = vector.multi_reduction <maximumf>, %27, %cst_15 [1] : vector<8x32xf32> to vector<8xf32>
    %29 = vector.shape_cast %28 : vector<8xf32> to vector<8x1xf32>
    %30 = vector.extract_strided_slice %14 {offsets = [0, 160], sizes = [8, 32], strides = [1, 1]} : vector<8x256xf32> to vector<8x32xf32>
    %cst_16 = arith.constant dense<0xFF800000> : vector<8xf32>
    %31 = vector.multi_reduction <maximumf>, %30, %cst_16 [1] : vector<8x32xf32> to vector<8xf32>
    %32 = vector.shape_cast %31 : vector<8xf32> to vector<8x1xf32>
    %33 = vector.extract_strided_slice %14 {offsets = [0, 192], sizes = [8, 32], strides = [1, 1]} : vector<8x256xf32> to vector<8x32xf32>
    %cst_17 = arith.constant dense<0xFF800000> : vector<8xf32>
    %34 = vector.multi_reduction <maximumf>, %33, %cst_17 [1] : vector<8x32xf32> to vector<8xf32>
    %35 = vector.shape_cast %34 : vector<8xf32> to vector<8x1xf32>
    %36 = vector.extract_strided_slice %14 {offsets = [0, 224], sizes = [8, 32], strides = [1, 1]} : vector<8x256xf32> to vector<8x32xf32>
    %cst_18 = arith.constant dense<0xFF800000> : vector<8xf32>
    %37 = vector.multi_reduction <maximumf>, %36, %cst_18 [1] : vector<8x32xf32> to vector<8xf32>
    %38 = vector.shape_cast %37 : vector<8xf32> to vector<8x1xf32>
    %39 = tpu.concatenate %17, %20, %23, %26, %29, %32, %35, %38 in 1 : vector<8x1xf32>, vector<8x1xf32>, vector<8x1xf32>, vector<8x1xf32>, vector<8x1xf32>, vector<8x1xf32>, vector<8x1xf32>, vector<8x1xf32> -> vector<8x8xf32>
    %c0_19 = arith.constant 0 : index
    %c0_20 = arith.constant 0 : index
    %40 = vector.load %arg6[%c0_19, %c0_20] : memref<8x256xf32, #tpu.memory_space<vmem>>, vector<8x256xf32>
    %cst_21 = arith.constant dense<0.000000e+00> : vector<8x256xf32>
    %41 = tpu.matmul %39, %40, %cst_21 {dimension_numbers = #tpu.dot_dimension_numbers<[1], [0], [0], [1], [0, 0, 1, 1], [], []>} : vector<8x8xf32>, vector<8x256xf32>, vector<8x256xf32> -> vector<8x256xf32>
    %42 = arith.subf %14, %41 : vector<8x256xf32>
    %43 = math.exp %42 : vector<8x256xf32>
    %c0_22 = arith.constant 0 : index
    %c0_23 = arith.constant 0 : index
    %44 = vector.load %arg7[%c0_22, %c0_23] : memref<256x256xf32, #tpu.memory_space<vmem>>, vector<256x256xf32>
    %cst_24 = arith.constant dense<0.000000e+00> : vector<8x256xf32>
    %45 = tpu.matmul %43, %44, %cst_24 {dimension_numbers = #tpu.dot_dimension_numbers<[1], [0], [0], [1], [0, 0, 1, 1], [], []>} : vector<8x256xf32>, vector<256x256xf32>, vector<8x256xf32> -> vector<8x256xf32>
    %46 = arith.divf %43, %45 : vector<8x256xf32>
    %c0_25 = arith.constant 0 : index
    %c0_26 = arith.constant 0 : index
    %47 = vector.load %arg5[%c0_25, %c0_26] : memref<8x8xf32, #tpu.memory_space<vmem>>, vector<8x8xf32>
    %c0_27 = arith.constant 0 : index
    %c0_28 = arith.constant 0 : index
    %48 = vector.load %arg6[%c0_27, %c0_28] : memref<8x256xf32, #tpu.memory_space<vmem>>, vector<8x256xf32>
    %cst_29 = arith.constant dense<0.000000e+00> : vector<8x256xf32>
    %49 = tpu.matmul %47, %48, %cst_29 {dimension_numbers = #tpu.dot_dimension_numbers<[1], [0], [0], [1], [0, 0, 1, 1], [], []>} : vector<8x8xf32>, vector<8x256xf32>, vector<8x256xf32> -> vector<8x256xf32>
    %50 = math.exp %46 : vector<8x256xf32>
    %51 = arith.mulf %49, %50 : vector<8x256xf32>
    %c0_30 = arith.constant 0 : index
    %c0_31 = arith.constant 0 : index
    %52 = vector.load %arg8[%c0_30, %c0_31] : memref<256x32xf32, #tpu.memory_space<vmem>>, vector<256x32xf32>
    %cst_32 = arith.constant dense<0.000000e+00> : vector<8x32xf32>
    %53 = tpu.matmul %51, %52, %cst_32 {dimension_numbers = #tpu.dot_dimension_numbers<[1], [0], [0], [1], [0, 0, 1, 1], [], []>} : vector<8x256xf32>, vector<256x32xf32>, vector<8x32xf32> -> vector<8x32xf32>
    %c0_33 = arith.constant 0 : index
    %c0_34 = arith.constant 0 : index
    %54 = vector.load %arg9[%c0_33, %c0_34] : memref<8x32xf32, #tpu.memory_space<vmem>>, vector<8x32xf32>
    tpu.vector_store %arg9[%c0_33, %c0_34], %53 {strides = array<i32>} : memref<8x32xf32, #tpu.memory_space<vmem>>, vector<8x32xf32>,
    return
  }
}

</mosaic_0001>

<bundles_post_ra>
// kernel: moe_forward.1
= control target key start
LH: loop header
LB: loop body
LE: loop exit
PB: predicated region body
PF: predicated region fallthrough
CT: control target
= control target key end

     0   :  { %v1090_v2 = vmov 0   ;;  %vm72_vm0 = vcmask 261120   ;;  %s1609_s0 = inlined_call_operand.vmem [shape: f32[8,32], index: 0, kind: input, shape index: {}]   ;;  %s1610_s1 = inlined_call_operand.vmem [shape: bf16[32,256], index: 1, kind: input, shape index: {}]   ;;  %s1611_s2 = inlined_call_operand.vmem [shape: f32[1,256], index: 2, kind: input, shape index: {}]   ;;  %s1612_s3 = inlined_call_operand.vmem [shape: bf16[256,256], index: 3, kind: input, shape index: {}]   ;;  %s1613_s4 = inlined_call_operand.vmem [shape: f32[1,256], index: 4, kind: input, shape index: {}]   ;;  %s1614_s5 = inlined_call_operand.vmem [shape: f32[8,8], index: 5, kind: input, shape index: {}]   ;;  %s1615_s6 = inlined_call_operand.vmem [shape: f32[8,256], index: 6, kind: input, shape index: {}]   ;;  %s1616_s7 = inlined_call_operand.vmem [shape: f32[256,256], index: 7, kind: input, shape index: {}]   ;;  %s1617_s8 = inlined_call_operand.vmem [shape: f32[256,32], index: 8, kind: input, shape index: {}]   ;;  %s1618_s9 = inlined_call_operand.hbm [shape: f32[8,32], index: 9, kind: output, shape index: {}]  }
   0x1   :  { %v1000_v0 = vld [vmem:[%s1610_s1 + $0x4] ss:$8 sps:$4 sm:$0xff]   ;;  %v1002_v1 = vld [vmem:[%s1610_s1] ss:$8 sps:$4 sm:$0xff]   ;;  %108 = vmatprep.mubr.bf16.mxu0 %v1090_v2  ;;  %v1003_v3 = vld [vmem:[%s1610_s1 + $0x14] ss:$8 sps:$4 sm:$0xff]  }
   0x2   :  { %76 = vmatprep.subr.bf16.mxu0 %v1000_v0  ;;  %v1005_v4 = vld [vmem:[%s1610_s1 + $0x10] ss:$8 sps:$4 sm:$0xff]   ;;  %v34_v5 = vld [vmem:[%s1609_s0] sm:$0xff]  ;;  %v1009_v8 = vld [vmem:[%s1612_s3 + $0x14] ss:$8 sps:$4 sm:$0xff]  }
   0x3   :  { %77 = vmatpush1.bf16.msra.mxu0 %v1002_v1  ;;  %v1006_v6 = vld [vmem:[%s1612_s3 + $0x4] ss:$8 sps:$4 sm:$0xff]   ;;  %v1008_v7 = vld [vmem:[%s1612_s3] ss:$8 sps:$4 sm:$0xff]   ;;  %v35_v9 = vpack.c.bf16 %v34_v5, %v34_v5  ;;  %v1011_v10 = vld [vmem:[%s1612_s3 + $0x10] ss:$8 sps:$4 sm:$0xff]  }
   0x4   :  { %78 = vmatprep.subr.bf16.mxu0 %v1003_v3  ;;  %325 = vmatprep.subr.bf16.mxu1 %v1006_v6  ;;  %v1012_v11 = vld [vmem:[%s1612_s3 + $0x24] ss:$8 sps:$4 sm:$0xff]   ;;  %v1014_v12 = vld [vmem:[%s1612_s3 + $0x20] ss:$8 sps:$4 sm:$0xff]   ;;  %v1015_v13 = vld [vmem:[%s1612_s3 + $0x34] ss:$8 sps:$4 sm:$0xff]  }
   0x5   :  { %326 = vmatpush1.bf16.msra.mxu1 %v1008_v7  ;;  %v1017_v14 = vld [vmem:[%s1612_s3 + $0x30] ss:$8 sps:$4 sm:$0xff]   ;;  %v1018_v15 = vld [vmem:[%s1612_s3 + $0x44] ss:$8 sps:$4 sm:$0xff]   ;;  %v1020_v16 = vld [vmem:[%s1612_s3 + $0x40] ss:$8 sps:$4 sm:$0xff]  }
   0x6   :  { %327 = vmatprep.subr.bf16.mxu1 %v1009_v8  ;;  %v1021_v17 = vld [vmem:[%s1612_s3 + $0x54] ss:$8 sps:$4 sm:$0xff]   ;;  %v1023_v18 = vld [vmem:[%s1612_s3 + $0x50] ss:$8 sps:$4 sm:$0xff]   ;;  %v1024_v19 = vld [vmem:[%s1612_s3 + $0x64] ss:$8 sps:$4 sm:$0xff]  }
   0x7   :  { %79 = vmatpush1.bf16.msra.mxu0 %v1005_v4 }
   0x9   :  { %328 = vmatpush1.bf16.msra.mxu1 %v1011_v10 }
   0xa   :  { %831 = vmatmul.mubr.msk.bf16.vlgmr.msra.gmra.mrb[0].mxu0 %vm72_vm0, %v35_v9  ;;  %329 = vmatprep.subr.bf16.mxu1 %v1012_v11 }
   0xd   :  { %330 = vmatpush1.bf16.msra.mxu1 %v1014_v12 }
   0xe   :  { %331 = vmatprep.subr.bf16.mxu1 %v1015_v13 }
  0x11   :  { %332 = vmatpush1.bf16.msra.mxu1 %v1017_v14 }
  0x12   :  { %333 = vmatprep.subr.bf16.mxu1 %v1018_v15 }
  0x15   :  { %334 = vmatpush1.bf16.msra.mxu1 %v1020_v16 }
  0x16   :  { %335 = vmatprep.subr.bf16.mxu1 %v1021_v17 }
  0x17   :  { %14 = vsyncpa [#allocation3], 0  ;;  %v1026_v20 = vld [vmem:[%s1612_s3 + $0x60] ss:$8 sps:$4 sm:$0xff]   ;;  %v1027_v21 = vld [vmem:[%s1612_s3 + $0x74] ss:$8 sps:$4 sm:$0xff]   ;;  %v42_v39 = vlaneseq }
  0x18   :  { %v1029_v22 = vld [vmem:[%s1612_s3 + $0x70] ss:$8 sps:$4 sm:$0xff]   ;;  %v1030_v23 = vld [vmem:[%s1612_s3 + $0x84] ss:$8 sps:$4 sm:$0xff]   ;;  %v1032_v24 = vld [vmem:[%s1612_s3 + $0x80] ss:$8 sps:$4 sm:$0xff]  }
  0x19   :  { %336 = vmatpush1.bf16.msra.mxu1 %v1023_v18  ;;  %v1033_v25 = vld [vmem:[%s1612_s3 + $0x94] ss:$8 sps:$4 sm:$0xff]   ;;  %v1035_v26 = vld [vmem:[%s1612_s3 + $0x90] ss:$8 sps:$4 sm:$0xff]   ;;  %v1036_v27 = vld [vmem:[%s1612_s3 + $0xa4] ss:$8 sps:$4 sm:$0xff]  }
  0x1a   :  { %337 = vmatprep.subr.bf16.mxu1 %v1024_v19  ;;  %v1038_v28 = vld [vmem:[%s1612_s3 + $0xa0] ss:$8 sps:$4 sm:$0xff]   ;;  %v1039_v29 = vld [vmem:[%s1612_s3 + $0xb4] ss:$8 sps:$4 sm:$0xff]   ;;  %v1041_v30 = vld [vmem:[%s1612_s3 + $0xb0] ss:$8 sps:$4 sm:$0xff]  }
  0x1b   :  { %v1042_v31 = vld [vmem:[%s1612_s3 + $0xc4] ss:$8 sps:$4 sm:$0xff]   ;;  %v1044_v32 = vld [vmem:[%s1612_s3 + $0xc0] ss:$8 sps:$4 sm:$0xff]   ;;  %v1045_v33 = vld [vmem:[%s1612_s3 + $0xd4] ss:$8 sps:$4 sm:$0xff]  }
  0x1c   :  { %v1047_v34 = vld [vmem:[%s1612_s3 + $0xd0] ss:$8 sps:$4 sm:$0xff]   ;;  %v1048_v35 = vld [vmem:[%s1612_s3 + $0xe4] ss:$8 sps:$4 sm:$0xff]   ;;  %v1050_v36 = vld [vmem:[%s1612_s3 + $0xe0] ss:$8 sps:$4 sm:$0xff]  }
  0x1d   :  { %338 = vmatpush1.bf16.msra.mxu1 %v1026_v20  ;;  %v1051_v37 = vld [vmem:[%s1612_s3 + $0xf4] ss:$8 sps:$4 sm:$0xff]   ;;  %v1053_v38 = vld [vmem:[%s1612_s3 + $0xf0] ss:$8 sps:$4 sm:$0xff]   ;;  %v43_v40 = vshrl.u32 %v42_v39, 7  ;;  %vm373_vm1 = vcmask 785920  }
  0x1e   :  { %339 = vmatprep.subr.bf16.mxu1 %v1027_v21  ;;  %v40_v42 = vld [vmem:[%s1611_s2] sm:$0x3]  ;;  %vm377_vm2 = vcmask 1048320   ;;  %vm369_vm3 = vcmask 523520   ;;  %v1280_v9 = vld [vmem:[%s1615_s6 + $0x8] sm:$0xff]  ;;  %v1091_v11 = vmov 0.0  }
  0x1f   :  { %v44_v41 = vsub.s32 0, %v43_v40  ;;  %v48_v43 = vsub.s32 1, %v43_v40  ;;  %v153_v56 = vld [vmem:[%s1613_s4] sm:$0x3]  ;;  %413 = vmatprep.subr.mxu0 %v1280_v9  ;;  %477 = vmatprep.mubr.f32.mxu0 %v1091_v11  ;;  %v491_v12 = vld [vmem:[%s1616_s7 + $0x8] sm:$0xff]  ;;  %v493_v13 = vld [vmem:[%s1616_s7 + $0x18] sm:$0xff] }
  0x20   :  { %v1285_v10 = vld [vmem:[%s1615_s6] sm:$0xff]  ;;  %v901_v14 = vpack.c.bf16 %v493_v13, %v491_v12  ;;  %vm393_vm4 = vcmask 7168   ;;  %vm395_vm5 = vcmask 15360   ;;  %vm397_vm6 = vcmask 23552   ;;  %v501_v39 = vld [vmem:[%s1616_s7 + $0x58] sm:$0xff] }
  0x21   :  { %340 = vmatpush1.bf16.msra.mxu1 %v1029_v22  ;;  %v45_v44 = vrot.slane %v40_v42, %v44_v41  ;;  %v49_v45 = vrot.slane %v40_v42, %v48_v43  ;;  %v158_v57 = vrot.slane %v153_v56, %v44_v41  ;;  %v162_v62 = vrot.slane %v153_v56, %v48_v43  ;;  %v498_v42 = vld [vmem:[%s1616_s7 + $0x40] sm:$0xff]  ;;  %v500_v43 = vld [vmem:[%s1616_s7 + $0x50] sm:$0xff]  ;;  %v511_v56 = vld [vmem:[%s1616_s7 + $0xa8] sm:$0xff] }
  0x22   :  { %341 = vmatprep.subr.bf16.mxu1 %v1030_v23  ;;  %414 = vmatpush1.msra.mxu0 %v1285_v10  ;;  %vm399_vm7 = vcmask 31744   ;;  %vm401_vm8 = vcmask 39936   ;;  %vm403_vm9 = vcmask 48128   ;;  %vm405_vm10 = vcmask 56320   ;;  %v518_v13 = vld [vmem:[%s1616_s7 + $0xe0] sm:$0xff] }
  0x23   :  { %902 = vmatprep.subr.bf16.mxu0 %v901_v14  ;;  %vm409_vm11 = vcmask 64512   ;;  %v520_v14 = vld [vmem:[%s1616_s7 + $0xf0] sm:$0xff] }
  0x25   :  { %342 = vmatpush1.bf16.msra.mxu1 %v1032_v24 }
  0x26   :  { %343 = vmatprep.subr.bf16.mxu1 %v1033_v25  ;;  %v490_v25 = vld [vmem:[%s1616_s7] sm:$0xff] }
  0x29   :  { %344 = vmatpush1.bf16.msra.mxu1 %v1035_v26  ;;  %v492_v26 = vld [vmem:[%s1616_s7 + $0x10] sm:$0xff] }
  0x2a   :  { %345 = vmatprep.subr.bf16.mxu1 %v1036_v27  ;;  %v495_v27 = vld [vmem:[%s1616_s7 + $0x28] sm:$0xff] }
  0x2d   :  { %346 = vmatpush1.bf16.msra.mxu1 %v1038_v28  ;;  %v497_v28 = vld [vmem:[%s1616_s7 + $0x38] sm:$0xff] }
  0x2e   :  { %347 = vmatprep.subr.bf16.mxu1 %v1039_v29 }
  0x31   :  { %348 = vmatpush1.bf16.msra.mxu1 %v1041_v30 }
  0x32   :  { %349 = vmatprep.subr.bf16.mxu1 %v1042_v31 }
  0x35   :  { %350 = vmatpush1.bf16.msra.mxu1 %v1044_v32  ;;  %v903_v32 = vpack.c.bf16 %v492_v26, %v490_v25  ;;  %v526_v25 = vld [vmem:[%s1616_s7 + $0x120] sm:$0xff]  ;;  %v528_v26 = vld [vmem:[%s1616_s7 + $0x130] sm:$0xff] }
  0x36   :  { %351 = vmatprep.subr.bf16.mxu1 %v1045_v33 }
  0x39   :  { %352 = vmatpush1.bf16.msra.mxu1 %v1047_v34  ;;  %v905_v34 = vpack.c.bf16 %v497_v28, %v495_v27  ;;  %v531_v27 = vld [vmem:[%s1616_s7 + $0x148] sm:$0xff]  ;;  %v533_v28 = vld [vmem:[%s1616_s7 + $0x158] sm:$0xff] }
  0x3a   :  { %353 = vmatprep.subr.bf16.mxu1 %v1048_v35  ;;  %v494_v35 = vld [vmem:[%s1616_s7 + $0x20] sm:$0xff] }
  0x3d   :  { %354 = vmatpush1.bf16.msra.mxu1 %v1050_v36  ;;  %v496_v36 = vld [vmem:[%s1616_s7 + $0x30] sm:$0xff] }
  0x3e   :  { %355 = vmatprep.subr.bf16.mxu1 %v1051_v37  ;;  %v907_v40 = vpack.c.bf16 %v496_v36, %v494_v35 }
  0x41   :  { %356 = vmatpush1.bf16.msra.mxu1 %v1053_v38  ;;  %v499_v38 = vld [vmem:[%s1616_s7 + $0x48] sm:$0xff] }
  0x42   :  { %v909_v41 = vpack.c.bf16 %v501_v39, %v499_v38  ;;  %v536_v38 = vld [vmem:[%s1616_s7 + $0x170] sm:$0xff] }
  0xdd   :  { %v110_v46 = vpop.f32.mrb[0].mxu0 }
  0xde   :  { %v111_v47 = vadd.f32 %v110_v46, %v45_v44  ;;  %v112_v48 = vpop.f32.mrb[1].mxu0  ;;  %v503_v44 = vld [vmem:[%s1616_s7 + $0x68] sm:$0xff]  ;;  %v911_v46 = vpack.c.bf16 %v500_v43, %v498_v42  ;;  %v538_v43 = vld [vmem:[%s1616_s7 + $0x180] sm:$0xff] }
  0xdf   :  { %v113_v49 = vadd.f32 %v112_v48, %v49_v45  ;;  %v114_v50 = vpop.f32.mrb[2].mxu0  ;;  %v505_v45 = vld [vmem:[%s1616_s7 + $0x78] sm:$0xff]  ;;  %v502_v48 = vld [vmem:[%s1616_s7 + $0x60] sm:$0xff] }
  0xe0   :  { %v117_v51 = vmax.f32 %v111_v47, 0.0  ;;  %v115_v52 = vpop.f32.mrb[3].mxu0  ;;  %v913_v47 = vpack.c.bf16 %v505_v45, %v503_v44  ;;  %v507_v50 = vld [vmem:[%s1616_s7 + $0x88] sm:$0xff]  ;;  %v540_v44 = vld [vmem:[%s1616_s7 + $0x190] sm:$0xff] }
  0xe1   :  { %v118_v53 = vmax.f32 %v113_v49, 0.0  ;;  %v504_v49 = vld [vmem:[%s1616_s7 + $0x70] sm:$0xff]  ;;  %v951_v45 = vpack.c.bf16 %v540_v44, %v538_v43  ;;  %v738_v44 = vld [vmem:[%s1617_s8 + $0xe0] sm:$0xff] }
  0xe2   :  { %v119_v55 = vpack.c.bf16 %v117_v51, %v117_v51  ;;  %v509_v51 = vld [vmem:[%s1616_s7 + $0x98] sm:$0xff]  ;;  %v915_v52 = vpack.c.bf16 %v504_v49, %v502_v48  ;;  %v542_v49 = vld [vmem:[%s1616_s7 + $0x1a0] sm:$0xff] }
  0xe3   :  { %v120_v54 = vpack.c.bf16 %v118_v53, %v118_v53  ;;  %v917_v53 = vpack.c.bf16 %v509_v51, %v507_v50  ;;  %v544_v50 = vld [vmem:[%s1616_s7 + $0x1b0] sm:$0xff] }
  0xe4   :  { %v955_v51 = vpack.c.bf16 %v544_v50, %v542_v49  ;;  %v723_v49 = vld [vmem:[%s1617_s8 + $0x68] sm:$0xff] }
  0xe5   :  { %357 = vmatprep.mubr.bf16.mxu1 %v120_v54  ;;  %v506_v54 = vld [vmem:[%s1616_s7 + $0x80] sm:$0xff] }
  0xe6   :  { %358 = vmatmul.mubr.bf16.vlgmr.msra.gmra.mrb[0].mxu1 %v119_v55  ;;  %v508_v55 = vld [vmem:[%s1616_s7 + $0x90] sm:$0xff] }
 0x1b9   :  { %v359_v58 = vpop.f32.mrb[0].mxu1 }
 0x1ba   :  { %v1261_v59 = vadd.f32 %v359_v58, %v158_v57  ;;  %v361_v60 = vpop.f32.mrb[1].mxu1  ;;  %v513_v57 = vld [vmem:[%s1616_s7 + $0xb8] sm:$0xff]  ;;  %v919_v58 = vpack.c.bf16 %v508_v55, %v506_v54  ;;  %v546_v54 = vld [vmem:[%s1616_s7 + $0x1c0] sm:$0xff] }
 0x1bb   :  { %v363_v61 = vpop.f32.mrb[2].mxu1  ;;  %v1267_v2 = vadd.f32 %v361_v60, %v162_v62  ;;  %v921_v60 = vpack.c.bf16 %v513_v57, %v511_v56  ;;  %v512_v62 = vld [vmem:[%s1616_s7 + $0xb0] sm:$0xff]  ;;  %v551_v57 = vld [vmem:[%s1616_s7 + $0x1e8] sm:$0xff] }
 0x1bc   :  { %v364_v63 = vpop.f32.mrb[3].mxu1  ;;  %v374_v0 = vsel %vm373_vm1, %v1261_v59, -inf  ;;  %v366_v1 = vsel %vm72_vm0, %v1261_v59, -inf  ;;  %v378_v3 = vsel %vm377_vm2, %v1261_v59, -inf  ;;  %v370_v4 = vsel %vm369_vm3, %v1261_v59, -inf  ;;  %v510_v61 = vld [vmem:[%s1616_s7 + $0xa0] sm:$0xff] }
 0x1bd   :  { %375 = vmax.xlane.f32.xlu1 %v374_v0  ;;  %367 = vmax.xlane.f32.xlu0 %v366_v1  ;;  %v384_v5 = vsel %vm369_vm3, %v1267_v2, -inf  ;;  %v381_v6 = vsel %vm72_vm0, %v1267_v2, -inf  ;;  %v390_v7 = vsel %vm377_vm2, %v1267_v2, -inf  ;;  %v387_v8 = vsel %vm373_vm1, %v1267_v2, -inf  ;;  %v515_v63 = vld [vmem:[%s1616_s7 + $0xc8] sm:$0xff]  ;;  %v517_v0 = vld [vmem:[%s1616_s7 + $0xd8] sm:$0xff] }
 0x1be   :  { %v923_v1 = vpack.c.bf16 %v512_v62, %v510_v61  ;;  %v548_v56 = vld [vmem:[%s1616_s7 + $0x1d0] sm:$0xff]  ;;  %v550_v62 = vld [vmem:[%s1616_s7 + $0x1e0] sm:$0xff] }
 0x1c1   :  { %379 = vmax.xlane.f32.xlu1 %v378_v3  ;;  %371 = vmax.xlane.f32.xlu0 %v370_v4  ;;  %v925_v3 = vpack.c.bf16 %v517_v0, %v515_v63  ;;  %v514_v4 = vld [vmem:[%s1616_s7 + $0xc0] sm:$0xff]  ;;  %v552_v63 = vld [vmem:[%s1616_s7 + $0x1f0] sm:$0xff] }
 0x1c2   :  { %v963_v0 = vpack.c.bf16 %v552_v63, %v550_v62 }
 0x1c5   :  { %385 = vmax.xlane.f32.xlu1 %v384_v5  ;;  %382 = vmax.xlane.f32.xlu0 %v381_v6  ;;  %v516_v5 = vld [vmem:[%s1616_s7 + $0xd0] sm:$0xff]  ;;  %v519_v6 = vld [vmem:[%s1616_s7 + $0xe8] sm:$0xff] }
 0x1c9   :  { %391 = vmax.xlane.f32.xlu1 %v390_v7  ;;  %388 = vmax.xlane.f32.xlu0 %v387_v8  ;;  %v521_v7 = vld [vmem:[%s1616_s7 + $0xf8] sm:$0xff]  ;;  %v927_v8 = vpack.c.bf16 %v516_v5, %v514_v4 }
 0x1ca   :  { %v929_v12 = vpack.c.bf16 %v521_v7, %v519_v6 }
 0x24a   :  { %v376_v15 = vpop.xlane.xlu1 %375  ;;  %v368_v16 = vpop.xlane.xlu0 %367 }
 0x24e   :  { %v380_v17 = vpop.xlane.xlu1 %379  ;;  %v372_v18 = vpop.xlane.xlu0 %371 }
 0x24f   :  { %v394_v19 = vsel %vm393_vm4, %v368_v16, %v372_v18  ;;  %v525_v16 = vld [vmem:[%s1616_s7 + $0x118] sm:$0xff] }
 0x250   :  { %v396_v20 = vsel %vm395_vm5, %v394_v19, %v376_v15  ;;  %v523_v15 = vld [vmem:[%s1616_s7 + $0x108] sm:$0xff]  ;;  %v522_v19 = vld [vmem:[%s1616_s7 + $0x100] sm:$0xff] }
 0x251   :  { %v398_v21 = vsel %vm397_vm6, %v396_v20, %v380_v17  ;;  %v931_v17 = vpack.c.bf16 %v520_v14, %v518_v13  ;;  %v933_v18 = vpack.c.bf16 %v525_v16, %v523_v15  ;;  %v524_v20 = vld [vmem:[%s1616_s7 + $0x110] sm:$0xff]  ;;  %v711_v15 = vld [vmem:[%s1617_s8 + $0x8] sm:$0xff] }
 0x252   :  { %v386_v22 = vpop.xlane.xlu1 %385  ;;  %v383_v23 = vpop.xlane.xlu0 %382 }
 0x253   :  { %v400_v24 = vsel %vm399_vm7, %v398_v21, %v383_v23  ;;  %v527_v21 = vld [vmem:[%s1616_s7 + $0x128] sm:$0xff]  ;;  %v935_v23 = vpack.c.bf16 %v524_v20, %v522_v19  ;;  %v713_v19 = vld [vmem:[%s1617_s8 + $0x18] sm:$0xff] }
 0x254   :  { %v402_v30 = vsel %vm401_vm8, %v400_v24, %v386_v22  ;;  %v529_v22 = vld [vmem:[%s1616_s7 + $0x138] sm:$0xff] }
 0x255   :  { %v937_v24 = vpack.c.bf16 %v529_v22, %v527_v21  ;;  %v730_v21 = vld [vmem:[%s1617_s8 + $0xa0] sm:$0xff]  ;;  %v731_v22 = vld [vmem:[%s1617_s8 + $0xa8] sm:$0xff] }
 0x256   :  { %v392_v29 = vpop.xlane.xlu1 %391  ;;  %v389_v31 = vpop.xlane.xlu0 %388 }
 0x257   :  { %v404_v33 = vsel %vm403_vm9, %v402_v30, %v389_v31  ;;  %v941_v30 = vpack.c.bf16 %v533_v28, %v531_v27  ;;  %v530_v31 = vld [vmem:[%s1616_s7 + $0x140] sm:$0xff]  ;;  %v732_v27 = vld [vmem:[%s1617_s8 + $0xb0] sm:$0xff]  ;;  %v733_v28 = vld [vmem:[%s1617_s8 + $0xb8] sm:$0xff] }
 0x258   :  { %v406_v37 = vsel %vm405_vm10, %v404_v33, %v392_v29  ;;  %v939_v29 = vpack.c.bf16 %v528_v26, %v526_v25  ;;  %v535_v33 = vld [vmem:[%s1616_s7 + $0x168] sm:$0xff] }
 0x259   :  { %864 = vmatmul.mubr.msk.f32.vlgmr.msra.gmra.mrb[4].mxu0 %vm409_vm11, %v406_v37  ;;  %v534_v37 = vld [vmem:[%s1616_s7 + $0x160] sm:$0xff]  ;;  %v715_v25 = vld [vmem:[%s1617_s8 + $0x28] sm:$0xff] }
 0x25a   :  { %904 = vmatpush1.bf16.msra.mxu0 %v903_v32  ;;  %v532_v32 = vld [vmem:[%s1616_s7 + $0x150] sm:$0xff]  ;;  %v947_v39 = vpack.c.bf16 %v536_v38, %v534_v37  ;;  %v719_v37 = vld [vmem:[%s1617_s8 + $0x48] sm:$0xff] }
 0x25b   :  { %906 = vmatprep.subr.bf16.mxu0 %v905_v34  ;;  %v537_v34 = vld [vmem:[%s1616_s7 + $0x178] sm:$0xff]  ;;  %v943_v35 = vpack.c.bf16 %v532_v32, %v530_v31  ;;  %v736_v38 = vld [vmem:[%s1617_s8 + $0xd0] sm:$0xff] }
 0x25c   :  { %v945_v36 = vpack.c.bf16 %v537_v34, %v535_v33  ;;  %v717_v31 = vld [vmem:[%s1617_s8 + $0x38] sm:$0xff]  ;;  %v734_v33 = vld [vmem:[%s1617_s8 + $0xc0] sm:$0xff]  ;;  %v735_v34 = vld [vmem:[%s1617_s8 + $0xc8] sm:$0xff] }
 0x25e   :  { %908 = vmatpush1.bf16.msra.mxu0 %v907_v40  ;;  %v539_v40 = vld [vmem:[%s1616_s7 + $0x188] sm:$0xff] }
 0x25f   :  { %910 = vmatprep.subr.bf16.mxu0 %v909_v41  ;;  %v541_v41 = vld [vmem:[%s1616_s7 + $0x198] sm:$0xff] }
 0x260   :  { %v949_v42 = vpack.c.bf16 %v541_v41, %v539_v40  ;;  %v737_v40 = vld [vmem:[%s1617_s8 + $0xd8] sm:$0xff]  ;;  %v720_v41 = vld [vmem:[%s1617_s8 + $0x50] sm:$0xff] }
 0x261   :  { %v985_v43 = vpack.c.bf16 %v737_v40, %v736_v38 }
 0x262   :  { %912 = vmatpush1.bf16.msra.mxu0 %v911_v46  ;;  %v543_v46 = vld [vmem:[%s1616_s7 + $0x1a8] sm:$0xff] }
 0x263   :  { %914 = vmatprep.subr.bf16.mxu0 %v913_v47  ;;  %v545_v47 = vld [vmem:[%s1616_s7 + $0x1b8] sm:$0xff] }
 0x264   :  { %v953_v48 = vpack.c.bf16 %v545_v47, %v543_v46 }
 0x266   :  { %916 = vmatpush1.bf16.msra.mxu0 %v915_v52  ;;  %v547_v52 = vld [vmem:[%s1616_s7 + $0x1c8] sm:$0xff] }
 0x267   :  { %918 = vmatprep.subr.bf16.mxu0 %v917_v53  ;;  %v549_v53 = vld [vmem:[%s1616_s7 + $0x1d8] sm:$0xff] }
 0x268   :  { %v957_v55 = vpack.c.bf16 %v549_v53, %v547_v52  ;;  %v741_v52 = vld [vmem:[%s1617_s8 + $0xf8] sm:$0xff] }
 0x26a   :  { %920 = vmatpush1.bf16.msra.mxu0 %v919_v58  ;;  %v553_v58 = vld [vmem:[%s1616_s7 + $0x1f8] sm:$0xff] }
 0x26b   :  { %922 = vmatprep.subr.bf16.mxu0 %v921_v60  ;;  %v959_v60 = vpack.c.bf16 %v548_v56, %v546_v54  ;;  %v961_v61 = vpack.c.bf16 %v553_v58, %v551_v57  ;;  %v724_v54 = vld [vmem:[%s1617_s8 + $0x70] sm:$0xff] }
 0x26e   :  { %924 = vmatpush1.bf16.msra.mxu0 %v923_v1  ;;  %v726_v1 = vld [vmem:[%s1617_s8 + $0x80] sm:$0xff] }
 0x26f   :  { %926 = vmatprep.subr.bf16.mxu0 %v925_v3  ;;  %v727_v3 = vld [vmem:[%s1617_s8 + $0x88] sm:$0xff] }
 0x270   :  { %v965_v4 = vpack.c.bf16 %v727_v3, %v726_v1 }
 0x272   :  { %928 = vmatpush1.bf16.msra.mxu0 %v927_v8  ;;  %966 = vmatprep.subr.bf16.mxu1 %v965_v4 }
 0x273   :  { %930 = vmatprep.subr.bf16.mxu0 %v929_v12 }
 0x276   :  { %932 = vmatpush1.bf16.msra.mxu0 %v931_v17 }
 0x277   :  { %934 = vmatprep.subr.bf16.mxu0 %v933_v18  ;;  %v712_v18 = vld [vmem:[%s1617_s8 + $0x10] sm:$0xff] }
 0x278   :  { %v971_v20 = vpack.c.bf16 %v713_v19, %v712_v18 }
 0x27a   :  { %936 = vmatpush1.bf16.msra.mxu0 %v935_v23  ;;  %v973_v23 = vpack.c.bf16 %v731_v22, %v730_v21 }
 0x27b   :  { %938 = vmatprep.subr.bf16.mxu0 %v937_v24  ;;  %v714_v24 = vld [vmem:[%s1617_s8 + $0x20] sm:$0xff] }
 0x27c   :  { %v975_v26 = vpack.c.bf16 %v715_v25, %v714_v24 }
 0x27e   :  { %940 = vmatpush1.bf16.msra.mxu0 %v939_v29  ;;  %v977_v29 = vpack.c.bf16 %v733_v28, %v732_v27 }
 0x27f   :  { %942 = vmatprep.subr.bf16.mxu0 %v941_v30  ;;  %v716_v30 = vld [vmem:[%s1617_s8 + $0x30] sm:$0xff] }
 0x280   :  { %v979_v32 = vpack.c.bf16 %v717_v31, %v716_v30 }
 0x282   :  { %944 = vmatpush1.bf16.msra.mxu0 %v943_v35  ;;  %v981_v35 = vpack.c.bf16 %v735_v34, %v734_v33 }
 0x283   :  { %946 = vmatprep.subr.bf16.mxu0 %v945_v36  ;;  %v718_v36 = vld [vmem:[%s1617_s8 + $0x40] sm:$0xff] }
 0x286   :  { %948 = vmatpush1.bf16.msra.mxu0 %v947_v39  ;;  %v983_v39 = vpack.c.bf16 %v719_v37, %v718_v36 }
 0x287   :  { %950 = vmatprep.subr.bf16.mxu0 %v949_v42  ;;  %v721_v42 = vld [vmem:[%s1617_s8 + $0x58] sm:$0xff] }
 0x288   :  { %v987_v46 = vpack.c.bf16 %v721_v42, %v720_v41 }
 0x28a   :  { %952 = vmatpush1.bf16.msra.mxu0 %v951_v45  ;;  %v739_v45 = vld [vmem:[%s1617_s8 + $0xe8] sm:$0xff] }
 0x28b   :  { %954 = vmatprep.subr.bf16.mxu0 %v953_v48  ;;  %v989_v47 = vpack.c.bf16 %v739_v45, %v738_v44  ;;  %v722_v48 = vld [vmem:[%s1617_s8 + $0x60] sm:$0xff] }
 0x28c   :  { %v991_v50 = vpack.c.bf16 %v723_v49, %v722_v48 }
 0x28e   :  { %956 = vmatpush1.bf16.msra.mxu0 %v955_v51  ;;  %v740_v51 = vld [vmem:[%s1617_s8 + $0xf0] sm:$0xff] }
 0x28f   :  { %958 = vmatprep.subr.bf16.mxu0 %v957_v55  ;;  %v993_v53 = vpack.c.bf16 %v741_v52, %v740_v51  ;;  %v725_v55 = vld [vmem:[%s1617_s8 + $0x78] sm:$0xff] }
 0x290   :  { %v995_v56 = vpack.c.bf16 %v725_v55, %v724_v54 }
 0x292   :  { %960 = vmatpush1.bf16.msra.mxu0 %v959_v60 }
 0x293   :  { %962 = vmatprep.subr.bf16.mxu0 %v961_v61 }
 0x296   :  { %964 = vmatpush1.bf16.msra.mxu0 %v963_v0 }
 0x297   :  { %633 = vmatprep.subr.mxu0 %v1280_v9 }
 0x32c   :  { %v479_v5 = vpop.f32.mrb[4].mxu0 }
 0x32d   :  { %v484_v6 = vsub.f32 %v1261_v59, %v479_v5  ;;  %v481_v7 = vpop.f32.mrb[5].mxu0  ;;  %v629_v59 = vld [vmem:[%s1614_s5] sm:$0xff] }
 0x32e   :  { %v485_v8 = vsub.f32 %v1267_v2, %v481_v7  ;;  %v710_v2 = vld [vmem:[%s1617_s8] sm:$0xff] }
 0x32f   :  { %v486_v12 = vmul.f32 1.442695, %v484_v6  ;;  %v967_v16 = vpack.c.bf16 %v711_v15, %v710_v2 }
 0x330   :  { %v488_v13 = vmul.f32 1.442695, %v485_v8 }
 0x331   :  { %968 = vmatpush3.bf16.msra.mxu1 %v967_v16 }
 0x332   :  { %1054 = vpow2.f32 %v488_v13 }
 0x333   :  { %1056 = vpow2.f32 %v486_v12 }
 0x33c   :  { %v1492_v9 = vpop.eup %1054 }
 0x33d   :  { %v1494_v14 = vpop.eup %1056  ;;  %618 = vmatprep.mubr.f32.mxu0 %v1492_v9 }
 0x33e   :  { %619 = vmatmul.mubr.f32.vlgmr.msra.gmra.mrb[6].mxu0 %v1494_v14 }
 0x33f   :  { %634 = vmatpush1.msra.mxu0 %v1285_v10  ;;  %697 = vmatprep.mubr.f32.mxu0 %v1091_v11  ;;  %v728_v10 = vld [vmem:[%s1617_s8 + $0x90] sm:$0xff]  ;;  %v729_v11 = vld [vmem:[%s1617_s8 + $0x98] sm:$0xff]  ;;  %s1092_s8 = smov [#allocation2]  }
 0x340   :  { %v969_v17 = vpack.c.bf16 %v729_v11, %v728_v10  ;;  %s819_s19 = sshll.u32 %s1092_s8, 4  ;;  %s820_s19 = int_to_ptr.vmem [resolvable:$true] %s819_s19 }
 0x341   :  { %s1066_s20 = scalar_lea.vmem %s820_s19, 128  ;;  %p1071_p1 = scmp.lt.s32.totalorder %s820_s19, %s820_s19 }
 0x342   :  { %865 = vmatmul.mubr.msk.f32.vlgmr.msra.gmra.mrb[8].mxu0 %vm409_vm11, %v629_v59  ;;  %970 = vmatprep.subr.bf16.mxu1 %v969_v17  ;;  %p1067_p0 = scmp.ne.s32.totalorder %s820_s19, %s1066_s20  ;;  %p1072_p2 = scmp.lt.s32.totalorder %s1066_s20, %s1066_s20 }
 0x343   :  { %972 = vmatpush3.bf16.msra.mxu1 %v971_v20 }
 0x344   :  { %974 = vmatprep.subr.bf16.mxu1 %v973_v23  ;;  %p1073_p3 = por %p1072_p2, %p1071_p1 }
 0x346   :  { %p1074_p4 = pnand %p1073_p3, %p1067_p0 }
 0x347   :  { %976 = vmatpush3.bf16.msra.mxu1 %v975_v26 }
 0x348   :  { %978 = vmatprep.subr.bf16.mxu1 %v977_v29 }
 0x34b   :  { %980 = vmatpush3.bf16.msra.mxu1 %v979_v32 }
 0x34c   :  { %982 = vmatprep.subr.bf16.mxu1 %v981_v35 }
 0x34f   :  { %984 = vmatpush3.bf16.msra.mxu1 %v983_v39 }
 0x350   :  { %986 = vmatprep.subr.bf16.mxu1 %v985_v43 }
 0x353   :  { %988 = vmatpush3.bf16.msra.mxu1 %v987_v46 }
 0x354   :  { %990 = vmatprep.subr.bf16.mxu1 %v989_v47 }
 0x357   :  { %992 = vmatpush3.bf16.msra.mxu1 %v991_v50 }
 0x358   :  { %994 = vmatprep.subr.bf16.mxu1 %v993_v53 }
 0x35b   :  { %996 = vmatpush3.bf16.msra.mxu1 %v995_v56 }
 0x411   :  { %v620_v57 = vpop.f32.mrb[6].mxu0 }
 0x412   :  { %1058 = vrcp.f32 %v620_v57  ;;  %v622_v58 = vpop.f32.mrb[7].mxu0 }
 0x413   :  { %1060 = vrcp.f32 %v622_v58 }
 0x415   :  { %v699_v60 = vpop.f32.mrb[8].mxu0 }
 0x416   :  { %v701_v61 = vpop.f32.mrb[9].mxu0 }
 0x41c   :  { %v1059_v62 = vpop.eup %1058 }
 0x41d   :  { %v1061_v63 = vpop.eup %1060  ;;  %v626_v0 = vmul.f32 %v1059_v62, %v1494_v14 }
 0x41e   :  { %v628_v1 = vmul.f32 %v1061_v63, %v1492_v9 }
 0x41f   :  { %v704_v3 = vmul.f32 1.442695, %v626_v0 }
 0x420   :  { %v706_v4 = vmul.f32 1.442695, %v628_v1 }
 0x421   :  { %1062 = vpow2.f32 %v704_v3 }
 0x422   :  { %1064 = vpow2.f32 %v706_v4 }
 0x42b   :  { %v1063_v5 = vpop.eup %1062 }
 0x42c   :  { %v1065_v6 = vpop.eup %1064  ;;  %v708_v7 = vmul.f32 %v1063_v5, %v699_v60 }
 0x42d   :  { %v709_v8 = vmul.f32 %v1065_v6, %v701_v61 }
 0x42f   :  { %806 = vmatprep.mubr.f32.mxu1 %v709_v8 }
 0x430   :  { %807 = vmatmul.mubr.f32.vlgmr.msra.gmra.mrb[4].mxu1 %v708_v7 }
 0x503   :  { %v898_v12 = vpop.f32.mrb[4].mxu1 }
 0x504   :  { %v899_v13 = vpop.f32.mrb[5].mxu1 }
 0x505   :  { %v900_v59 = vadd.f32 %v899_v13, %v898_v12 }
 0x507   :  { %812 = vst.msk [vmem:[#allocation2] sm:$0xff] %vm72_vm0, %v900_v59 }
 0x508   :  { %1077 = shalt.err (!%p1074_p4)
}
 0x509   :  { %s1078_s6 = scalar_lea.hbm %s1618_s9, 128 }
 0x50a   :  { %p1079_p5 = scmp.ne.s32.totalorder %s1618_s9, %s1078_s6  ;;  %p1082_p6 = scmp.lt.u32.totalorder %s1078_s6, %s1618_s9 }
 0x50c   :  { %p1084_p7 = pnand %p1082_p6, %p1079_p5 }
 0x50e   :  { %1087 = shalt.err (!%p1084_p7)
}
 0x50f   :  { %822 = dma.vmem_to_hbm [thread:$0]  %s820_s19, 128, %s1618_s9, [#allocation3]  }
 0x510   :  { %1088 = dma.done.wait [#allocation3], 128  }
 0x511   :  { %1089 = vsyncadd [#allocation3], 4294967168 }
 0x512   :  { %826 = vsyncpa [#allocation3], 1 }

</bundles_post_ra>
